<compile_context>
chip_gen: v7x
topology: tpu7x:2x2x1
jax: 0.10.0
libtpu: 0.0.40
codegen_flags: <defaults>
</compile_context>

<pallas_src>
import functools

import jax
import jax.numpy as jnp
from jax.experimental import pallas as pl
from jax.experimental.pallas import tpu as pltpu


def _gemm_bias_kernel(x_ref, wt_ref, b_ref, o_ref):
    # x_ref:  (TM, Kp)   im2col patch rows (lane-dense, zero padded)
    # wt_ref: (Cp8, Kp)  flattened conv weights, transposed (Cout on sublanes)
    # b_ref:  (Cp8, 1)   bias column
    # o_ref:  (Cp8, TM)  transposed, lane-dense output tile (M on lanes)
    acc = jax.lax.dot_general(
        wt_ref[...], x_ref[...],
        dimension_numbers=(((1,), (1,)), ((), ())),   # 'ck,mk->cm'
        preferred_element_type=jnp.float32,
        precision=jax.lax.Precision.HIGHEST)
    o_ref[...] = (acc + b_ref[...]).astype(o_ref.dtype)


def _round_up(x, m):
    return ((x + m - 1) // m) * m


def _pick_tm(m):
    # Largest of {1024, 512, 256} that keeps >= 2 grid blocks (so v7x's two
    # TensorCores both get work); single lane-dense block for tiny M.
    m128 = _round_up(m, 128)
    for tm in (1024, 512, 256):
        if m128 >= 2 * tm:
            return tm
    return min(m128, 256)


@functools.partial(jax.jit, static_argnames=("padding",))
def random_conv_layer(x_nchw, weight, bias, *, padding=1):
    """Forward of RandomConvLayer: F.conv2d(x, weight, bias, stride=1, padding=1)."""
    N, Cin, H, W = x_nchw.shape
    Cout, Cin_w, K, K2 = weight.shape
    assert Cin == Cin_w and K == K2

    # ---- im2col in the wrapper (fused by XLA) -------------------------------
    x_nhwc = jnp.transpose(x_nchw, (0, 2, 3, 1)).astype(jnp.float32)
    xp = jnp.pad(x_nhwc, ((0, 0), (padding, padding), (padding, padding), (0, 0)))
    Hp, Wp = H + 2 * padding, W + 2 * padding
    Ho, Wo = Hp - K + 1, Wp - K + 1

    KKC = K * K * Cin
    M = N * Ho * Wo

    # Lane-dense padded GEMM dims.
    # TODO(synk): on v6e/v7x with real KKC/Cout > 128, round these to 256 to
    # match the 256x256 MXU; 128 is already matched for v5e and the toy dims.
    Kp = _round_up(KKC, 128)           # contraction lanes
    Cp8 = _round_up(Cout, 8)           # output-channel sublanes (NOT 128 lanes)
    TM = _pick_tm(M)                   # M tile, multiple of 128 (output lanes)
    Mp = _round_up(M, TM)

    # (N, Ho, Wo, Kp) with ordering [kh, kw, cin]; the Kp-KKC lane pad is part
    # of the concat so the slab is materialized in HBM exactly once.
    parts = [xp[:, kh:kh + Ho, kw:kw + Wo, :] for kh in range(K) for kw in range(K)]
    if Kp > KKC:
        parts.append(jnp.zeros((N, Ho, Wo, Kp - KKC), jnp.float32))
    patches = jnp.concatenate(parts, axis=-1).reshape(M, Kp)
    if Mp > M:
        patches = jnp.pad(patches, ((0, Mp - M), (0, 0)))

    # OIHW -> (Cout, K*K*Cin) with matching [kh, kw, cin] ordering, zero-padded
    # to (Cp8, Kp). Bias as a (Cp8, 1) column.
    w_t = jnp.transpose(weight, (0, 2, 3, 1)).reshape(Cout, KKC).astype(jnp.float32)
    w_t = jnp.pad(w_t, ((0, Cp8 - Cout), (0, Kp - KKC)))
    b_col = jnp.pad(bias.astype(jnp.float32).reshape(Cout, 1),
                    ((0, Cp8 - Cout), (0, 0)))

    grid = (Mp // TM,)
    # Useful (unpadded) work only -- padded zeros are not real FLOPs/bytes.
    cost = pl.CostEstimate(
        flops=2 * M * KKC * Cout,
        transcendentals=0,
        bytes_accessed=4 * (M * KKC + Cout * KKC + Cout + M * Cout))

    # TODO(synk): for large realistic Cin*K*K (>> 128), add a trailing
    # "arbitrary" K-reduction grid axis with an f32 VMEM accumulator and a
    # 512-1024 Kt tile so a (TM, KKC) block never blows v7x's 64 MiB VMEM.
    out2d = pl.pallas_call(
        _gemm_bias_kernel,
        out_shape=jax.ShapeDtypeStruct((Cp8, Mp), jnp.float32),
        grid_spec=pltpu.PrefetchScalarGridSpec(
            num_scalar_prefetch=0,
            grid=grid,
            in_specs=[
                pl.BlockSpec((TM, Kp), lambda i: (i, 0)),
                pl.BlockSpec((Cp8, Kp), lambda i: (0, 0)),
                pl.BlockSpec((Cp8, 1), lambda i: (0, 0)),
            ],
            out_specs=pl.BlockSpec((Cp8, TM), lambda i: (0, i)),
        ),
        compiler_params=pltpu.CompilerParams(
            dimension_semantics=("parallel",)),
        cost_estimate=cost,
    )(patches, w_t, b_col)

    # (Cout, M) -> NCHW. Only Cout*M real elements come back (no 128-lane pad).
    out = out2d[:Cout, :M].reshape(Cout, N, Ho, Wo)
    return jnp.transpose(out, (1, 0, 2, 3))


if __name__ == "__main__":
    # Small shapes consistent with the module: batch=2, in_channels=4,
    # out_channels=8, spatial=16, kernel_size=3 (padding=1 -> same-size output).
    N, Cin, Cout, H, W, K = 2, 4, 8, 16, 16, 3

    key = jax.random.PRNGKey(0)
    kx, kw = jax.random.split(key)
    x = jax.random.normal(kx, (N, Cin, H, W), dtype=jnp.float32)
    # Deterministic synthetic params (torch.randn / torch.zeros equivalents).
    weight = jax.random.normal(kw, (Cout, Cin, K, K), dtype=jnp.float32)
    bias = jnp.zeros((Cout,), dtype=jnp.float32)

    out = random_conv_layer(x, weight, bias)
    out = jax.block_until_ready(out)

    # Reference check against XLA's conv (same semantics as F.conv2d).
    ref = jax.lax.conv_general_dilated(
        x, weight, window_strides=(1, 1), padding=((1, 1), (1, 1)),
        dimension_numbers=("NCHW", "OIHW", "NCHW"),
        precision=jax.lax.Precision.HIGHEST)
    ref = ref + bias.reshape(1, Cout, 1, 1)
    assert out.shape == (N, Cout, H, W)
    assert jnp.allclose(out, ref, atol=1e-4, rtol=1e-4)

    print("KERNEL_OK")
</pallas_src>

<mosaic_0001>
module attributes {stable_mosaic.version = 11 : i64} {
  func.func @_gemm_bias_kernel(%arg0: i32, %arg1: memref<256x128xf32, #tpu.memory_space<vmem>>, %arg2: memref<8x128xf32, #tpu.memory_space<vmem>>, %arg3: memref<8x1xf32, #tpu.memory_space<vmem>>, %arg4: memref<8x256xf32, #tpu.memory_space<vmem>>) attributes {dimension_semantics = [#tpu.dimension_semantics<parallel>], iteration_bounds = array<i64: 2>, scalar_prefetch = 0 : i64, scratch_operands = 0 : i64, tpu.core_type = #tpu.core_type<tc>, window_params = [{transform_indices = @transform_0, window_bounds = array<i64: 256, 128>}, {pipeline_mode = #tpu.pipeline_mode<synchronous>, transform_indices = @transform_1, window_bounds = array<i64: 8, 128>}, {pipeline_mode = #tpu.pipeline_mode<synchronous>, transform_indices = @transform_2, window_bounds = array<i64: 8, 1>}, {transform_indices = @transform_3, window_bounds = array<i64: 8, 256>}]} {
    %c0 = arith.constant 0 : index
    %c0_0 = arith.constant 0 : index
    %0 = vector.load %arg2[%c0, %c0_0] : memref<8x128xf32, #tpu.memory_space<vmem>>, vector<8x128xf32>
    %c0_1 = arith.constant 0 : index
    %c0_2 = arith.constant 0 : index
    %1 = vector.load %arg1[%c0_1, %c0_2] : memref<256x128xf32, #tpu.memory_space<vmem>>, vector<256x128xf32>
    %cst = arith.constant dense<0.000000e+00> : vector<8x256xf32>
    %2 = tpu.matmul %0, %1, %cst {dimension_numbers = #tpu.dot_dimension_numbers<[1], [1], [0], [0], [0, 0, 1, 0], [], []>, precision = #tpu.contract_precision<fp32>} : vector<8x128xf32>, vector<256x128xf32>, vector<8x256xf32> -> vector<8x256xf32>
    %c0_3 = arith.constant 0 : index
    %c0_4 = arith.constant 0 : index
    %3 = vector.load %arg3[%c0_3, %c0_4] : memref<8x1xf32, #tpu.memory_space<vmem>>, vector<8x1xf32>
    %4 = vector.broadcast %3 : vector<8x1xf32> to vector<8x256xf32>
    %5 = arith.addf %2, %4 : vector<8x256xf32>
    %c0_5 = arith.constant 0 : index
    %c0_6 = arith.constant 0 : index
    %6 = vector.load %arg4[%c0_5, %c0_6] : memref<8x256xf32, #tpu.memory_space<vmem>>, vector<8x256xf32>
    tpu.vector_store %arg4[%c0_5, %c0_6], %5 {strides = array<i32>} : memref<8x256xf32, #tpu.memory_space<vmem>>, vector<8x256xf32>,
    return
  }
  func.func @transform_0(%arg0: i32) -> (i32, i32) {
    %c0_i32 = arith.constant 0 : i32
    %c0_i32_0 = arith.constant 0 : i32
    return %arg0, %c0_i32 : i32, i32
  }
  func.func @transform_1(%arg0: i32) -> (i32, i32) {
    %c0_i32 = arith.constant 0 : i32
    %c0_i32_0 = arith.constant 0 : i32
    %c0_i32_1 = arith.constant 0 : i32
    return %c0_i32, %c0_i32_0 : i32, i32
  }
  func.func @transform_2(%arg0: i32) -> (i32, i32) {
    %c0_i32 = arith.constant 0 : i32
    %c0_i32_0 = arith.constant 0 : i32
    %c0_i32_1 = arith.constant 0 : i32
    return %c0_i32, %c0_i32_0 : i32, i32
  }
  func.func @transform_3(%arg0: i32) -> (i32, i32) {
    %c0_i32 = arith.constant 0 : i32
    %c0_i32_0 = arith.constant 0 : i32
    return %c0_i32, %arg0 : i32, i32
  }
}

</mosaic_0001>

<bundles_post_ra>
// kernel: random_conv_layer.1
= control target key start
LH: loop header
LB: loop body
LE: loop exit
PB: predicated region body
PF: predicated region fallthrough
CT: control target
= control target key end

     0   :  { %s1584_s12 = smov 0   ;;  %s2073_s0 = inlined_call_operand.vmem [shape: f32[512,128], index: 0, kind: input, shape index: {}]   ;;  %s2074_s1 = inlined_call_operand.vmem [shape: f32[8,128], index: 1, kind: input, shape index: {}]   ;;  %s2075_s2 = inlined_call_operand.vmem [shape: f32[8,1], index: 2, kind: input, shape index: {}]   ;;  %s2076_s3 = inlined_call_operand.vmem [shape: f32[8,512], index: 3, kind: output, shape index: {}]  }
   0x1 LB: > { %s1126_s13 = sadd.s32 4294967295, %s1561_s12   ;;  %p1130_p0 = scmp.ge.s32.totalorder %s1561_s12, 1  ;;  %s1561_s12 = sphi %s1584_s12, %s13_s12  }
   0x2   : > { %p138_p1 = scmp.lt.s32.totalorder %s1561_s12, 3 }
   0x4   : > { %p139_p2 = pnand %p1130_p0, %p138_p1 }
   0x6   : > { %142 = sbr.rel (%p139_p2) target bundleno = 434 (0x1b2), region = 32 }
   0xd   : > { %s1131_s14 = sshll.u32 %s1126_s13, 5  ;;  %v174_v0 = vld [vmem:[%s2074_s1] sm:$0xff]  ;;  %s1133_s23 = sshll.u32 %s1126_s13, 1 }
   0xe   : > { %p163_p3 = scmp.lt.s32.totalorder %s1131_s14, 63  ;;  %v1597_v1 = vand.u32 4294901760, %v174_v0  ;;  %p169_p4 = scmp.lt.s32.totalorder %s1133_s23, 3 }
  0x10   : > { %s2144_s14 = smov (!%p163_p3, %s1131_s14), 63  ;;  %v1600_v2 = vsub.f32 %v174_v0, %v1597_v1  ;;  %s2146_s23 = smov (!%p169_p4, %s1133_s23), 3 }
  0x11   : > { %s1132_s17 = sshll.u32 %s2144_s14, 3  ;;  %s1134_s24 = sshll.u32 %s2146_s23, 3 }
  0x12   : > { %v1603_v3 = vand.u32 4294901760, %v1600_v2  ;;  %s1608_s20 = scalar_lea.vmem %s2073_s0, %s1132_s17  ;;  %s172_s27 = scalar_lea.vmem %s2076_s3, %s1134_s24 }
  0x13   : > { %v1611_v4 = vld [vmem:[%s1608_s20 + $0x80] sm:$0xff]  ;;  %v1614_v5 = vld [vmem:[%s1608_s20 + $0x88] sm:$0xff]  ;;  %v1627_v11 = vld [vmem:[%s1608_s20 + $0x90] sm:$0xff] }
  0x14   : > { %v1617_v6 = vld [vmem:[%s1608_s20] sm:$0xff]  ;;  %1271 = vmatprep.mubr.f32.mxu0 %v1603_v3  ;;  %v262_v7 = vand.u32 4294901760, %v1611_v4  ;;  %v265_v8 = vand.u32 4294901760, %v1614_v5  ;;  %v1623_v9 = vld [vmem:[%s1608_s20 + $0x8] sm:$0xff]  ;;  %v1630_v12 = vld [vmem:[%s1608_s20 + $0x98] sm:$0xff]  ;;  %v268_v14 = vand.u32 4294901760, %v1627_v11  ;;  %v313_v37 = vsub.f32 %v1600_v2, %v1603_v3 }
  0x15   : > { %v214_v10 = vand.u32 4294901760, %v1617_v6  ;;  %v217_v13 = vand.u32 4294901760, %v1623_v9  ;;  %v271_v15 = vand.u32 4294901760, %v1630_v12  ;;  %v1642_v17 = vld [vmem:[%s1608_s20 + $0x10] sm:$0xff]  ;;  %v1645_v18 = vld [vmem:[%s1608_s20 + $0x18] sm:$0xff]  ;;  %v1660_v21 = vld [vmem:[%s1608_s20 + $0xa0] sm:$0xff] }
  0x16   : > { %v1639_v16 = vpack.c.bf16 %v265_v8, %v262_v7  ;;  %v1663_v22 = vld [vmem:[%s1608_s20 + $0xa8] sm:$0xff]  ;;  %v220_v23 = vand.u32 4294901760, %v1642_v17  ;;  %v2083_v24 = vand.u32 4294901760, %v1645_v18  ;;  %v2082_v25 = vand.u32 4294901760, %v1660_v21  ;;  %v1688_v29 = vld [vmem:[%s1608_s20 + $0x20] sm:$0xff]  ;;  %v1694_v31 = vld [vmem:[%s1608_s20 + $0xb0] sm:$0xff] }
  0x17   : > { %v1651_v19 = vpack.c.bf16 %v217_v13, %v214_v10  ;;  %v1657_v20 = vpack.c.bf16 %v271_v15, %v268_v14  ;;  %v2081_v26 = vand.u32 4294901760, %v1663_v22  ;;  %v1691_v30 = vld [vmem:[%s1608_s20 + $0x28] sm:$0xff]  ;;  %v1697_v32 = vld [vmem:[%s1608_s20 + $0xb8] sm:$0xff]  ;;  %v2080_v33 = vand.u32 4294901760, %v1688_v29  ;;  %v181_v40 = vld [vmem:[%s1608_s20 + $0x30] sm:$0xff] }
  0x18   : > { %1342 = vmatprep.subr.bf16.mxu1 %v1639_v16  ;;  %1438 = vmatprep.subr.bf16.mxu0 %v1639_v16  ;;  %v1679_v27 = vpack.c.bf16 %v2083_v24, %v220_v23  ;;  %v2079_v34 = vand.u32 4294901760, %v1691_v30  ;;  %v2078_v35 = vand.u32 4294901760, %v1694_v31  ;;  %v2077_v36 = vand.u32 4294901760, %v1697_v32  ;;  %v182_v41 = vld [vmem:[%s1608_s20 + $0x38] sm:$0xff]  ;;  %v199_v42 = vld [vmem:[%s1608_s20 + $0xc0] sm:$0xff]  ;;  %v1725_v43 = vld [vmem:[%s1608_s20 + $0xc8] sm:$0xff] }
  0x19   : > { %1344 = vmatpush3.bf16.xpose.msra.mxu1 %v1651_v19  ;;  %1440 = vmatpush3.bf16.xpose.msra.mxu0 %v1651_v19  ;;  %v1685_v28 = vpack.c.bf16 %v2081_v26, %v2082_v25  ;;  %v1727_v44 = vand.u32 4294901760, %v313_v37  ;;  %v232_v45 = vand.u32 4294901760, %v181_v40  ;;  %v235_v46 = vand.u32 4294901760, %v182_v41  ;;  %v183_v51 = vld [vmem:[%s1608_s20 + $0x40] sm:$0xff]  ;;  %v184_v52 = vld [vmem:[%s1608_s20 + $0x48] sm:$0xff]  ;;  %v201_v53 = vld [vmem:[%s1608_s20 + $0xd0] sm:$0xff] }
  0x1a   : > { %1346 = vmatprep.subr.bf16.mxu1 %v1657_v20  ;;  %1442 = vmatprep.subr.bf16.mxu0 %v1657_v20  ;;  %v1713_v38 = vpack.c.bf16 %v2079_v34, %v2080_v33  ;;  %v1719_v39 = vpack.c.bf16 %v2077_v36, %v2078_v35  ;;  %v286_v47 = vand.u32 4294901760, %v199_v42  ;;  %v289_v48 = vand.u32 4294901760, %v1725_v43  ;;  %v202_v54 = vld [vmem:[%s1608_s20 + $0xd8] sm:$0xff]  ;;  %v185_v61 = vld [vmem:[%s1608_s20 + $0x50] sm:$0xff]  ;;  %v203_v63 = vld [vmem:[%s1608_s20 + $0xe0] sm:$0xff] }
  0x1b   : > { %2096 = vst [vmem:[#allocation2_spill] sm:$0xff] %v1685_v28  ;;  %1169 = vmatprep.mubr.f32.mxu1 %v1727_v44  ;;  %v1735_v49 = vpack.c.bf16 %v235_v46, %v232_v45  ;;  %v238_v55 = vand.u32 4294901760, %v183_v51  ;;  %v241_v56 = vand.u32 4294901760, %v184_v52  ;;  %v292_v57 = vand.u32 4294901760, %v201_v53  ;;  %v186_v62 = vld [vmem:[%s1608_s20 + $0x58] sm:$0xff]  ;;  %v204_v0 = vld [vmem:[%s1608_s20 + $0xe8] sm:$0xff] }
  0x1c   : > { %2097 = vst [vmem:[#allocation3_spill] sm:$0xff] %v1713_v38  ;;  %2098 = vst [vmem:[#allocation4_spill] sm:$0xff] %v1719_v39  ;;  %v1737_v50 = vpack.c.bf16 %v289_v48, %v286_v47  ;;  %v295_v58 = vand.u32 4294901760, %v202_v54  ;;  %v244_v37 = vand.u32 4294901760, %v185_v61  ;;  %v247_v36 = vand.u32 4294901760, %v186_v62 }
  0x1d   : > { %2099 = vst [vmem:[#allocation5_spill] sm:$0xff] %v1735_v49  ;;  %v1747_v59 = vpack.c.bf16 %v241_v56, %v238_v55  ;;  %v298_v35 = vand.u32 4294901760, %v203_v63  ;;  %v301_v34 = vand.u32 4294901760, %v204_v0  ;;  %v1762_v33 = vsub.f32 %v1611_v4, %v262_v7 }
  0x1e   : > { %2100 = vst [vmem:[#allocation6_spill] sm:$0xff] %v1737_v50  ;;  %v1749_v60 = vpack.c.bf16 %v295_v58, %v292_v57  ;;  %v1767_v26 = vsub.f32 %v1614_v5, %v265_v8  ;;  %v1772_v25 = vsub.f32 %v1617_v6, %v214_v10  ;;  %v1777_v24 = vsub.f32 %v1623_v9, %v217_v13  ;;  %v187_v10 = vld [vmem:[%s1608_s20 + $0x60] sm:$0xff] }
  0x1f   : > { %2101 = vst [vmem:[#allocation7_spill] sm:$0xff] %v1747_v59  ;;  %v1782_v4 = vsub.f32 %v1627_v11, %v268_v14  ;;  %v1787_v5 = vsub.f32 %v1630_v12, %v271_v15  ;;  %v1792_v6 = vsub.f32 %v1642_v17, %v220_v23  ;;  %v2103_v7 = vand.u32 4294901760, %v1645_v18  ;;  %v188_v11 = vld [vmem:[%s1608_s20 + $0x68] sm:$0xff] }
  0x20   : > { %2102 = vst [vmem:[#allocation8_spill] sm:$0xff] %v1749_v60  ;;  %v1799_v9 = vpack.c.bf16 %v247_v36, %v244_v37  ;;  %v2105_v13 = vand.u32 4294901760, %v1660_v21  ;;  %v2106_v12 = vand.u32 4294901760, %v1663_v22  ;;  %v2107_v17 = vand.u32 4294901760, %v1688_v29 }
  0x21   : > { %1348 = vmatpush3.bf16.xpose.msra.mxu1 %v1679_v27  ;;  %1444 = vmatpush3.bf16.xpose.msra.mxu0 %v1679_v27  ;;  %v1797_v8 = vsub.f32 %v1645_v18, %v2103_v7  ;;  %v1818_v18 = vpack.c.bf16 %v301_v34, %v298_v35  ;;  %v2109_v7 = vand.u32 4294901760, %v1691_v30 }
  0x22   : > { %1350 = vmatprep.subr.bf16.mxu1 %v1685_v28  ;;  %1446 = vmatprep.subr.bf16.mxu0 %v1685_v28  ;;  %2104 = vst [vmem:[#allocation9_spill] sm:$0xff] %v1799_v9  ;;  %v1806_v14 = vsub.f32 %v1660_v21, %v2105_v13  ;;  %v1811_v15 = vsub.f32 %v1663_v22, %v2106_v12  ;;  %v2110_v21 = vand.u32 4294901760, %v1694_v31  ;;  %v2111_v22 = vand.u32 4294901760, %v1697_v32 }
  0x23   : > { %v1816_v23 = vsub.f32 %v1688_v29, %v2107_v17  ;;  %2108 = vst [vmem:[#allocation10_spill] sm:$0xff] %v1818_v18  ;;  %v205_v29 = vld [vmem:[%s1608_s20 + $0xf0] sm:$0xff]  ;;  %v206_v17 = vld [vmem:[%s1608_s20 + $0xf8] sm:$0xff] }
  0x24   : > { %v1828_v13 = vsub.f32 %v1694_v31, %v2110_v21  ;;  %v1833_v12 = vsub.f32 %v1697_v32, %v2111_v22  ;;  %v1844_v31 = vsub.f32 %v1725_v43, %v289_v48  ;;  %v1846_v21 = vsub.f32 %v183_v51, %v238_v55  ;;  %v189_v43 = vld [vmem:[%s1608_s20 + $0x70] sm:$0xff] }
  0x25   : > { %v436_v32 = vand.u32 4294901760, %v1762_v33  ;;  %v1862_v48 = vsub.f32 %v185_v61, %v244_v37  ;;  %v1864_v51 = vsub.f32 %v186_v62, %v247_v36  ;;  %v256_v22 = vand.u32 4294901760, %v189_v43 }
  0x26   : > { %v450_v37 = vand.u32 4294901760, %v1782_v4 }
  0x27   : > { %v1887_v62 = vsub.f32 %v189_v43, %v256_v22  ;;  %v457_v43 = vand.u32 4294901760, %v1787_v5 }
  0x29   : > { %1352 = vmatpush3.bf16.xpose.msra.mxu1 %v1713_v38  ;;  %1448 = vmatpush3.bf16.xpose.msra.mxu0 %v1713_v38 }
  0x2a   : > { %1354 = vmatprep.subr.bf16.mxu1 %v1719_v39  ;;  %1450 = vmatprep.subr.bf16.mxu0 %v1719_v39  ;;  %v1848_v39 = vsub.f32 %v184_v52, %v241_v56  ;;  %v1866_v52 = vsub.f32 %v203_v63, %v298_v35  ;;  %v324_v35 = vand.u32 4294901760, %v1772_v25 }
  0x31   : > { %1356 = vmatpush3.bf16.xpose.msra.mxu1 %v1735_v49  ;;  %1452 = vmatpush3.bf16.xpose.msra.mxu0 %v1735_v49  ;;  %v253_v49 = vand.u32 4294901760, %v188_v11 }
  0x32   : > { %1358 = vmatprep.subr.bf16.mxu1 %v1737_v50  ;;  %1454 = vmatprep.subr.bf16.mxu0 %v1737_v50  ;;  %v1839_v50 = vsub.f32 %v182_v41, %v235_v46  ;;  %v304_v41 = vand.u32 4294901760, %v205_v29  ;;  %v443_v46 = vand.u32 4294901760, %v1767_v26 }
  0x34   : > { %v1881_v36 = vsub.f32 %v205_v29, %v304_v41 }
  0x39   : > { %1360 = vmatpush3.bf16.xpose.msra.mxu1 %v1747_v59  ;;  %1456 = vmatpush3.bf16.xpose.msra.mxu0 %v1747_v59  ;;  %v1835_v59 = vsub.f32 %v181_v40, %v232_v45  ;;  %v1853_v40 = vsub.f32 %v201_v53, %v292_v57  ;;  %v190_v45 = vld [vmem:[%s1608_s20 + $0x78] sm:$0xff]  ;;  %v1868_v53 = vsub.f32 %v204_v0, %v301_v34  ;;  %v331_v0 = vand.u32 4294901760, %v1777_v24 }
  0x3a   : > { %1362 = vmatprep.subr.bf16.mxu1 %v1749_v60  ;;  %1458 = vmatprep.subr.bf16.mxu0 %v1749_v60  ;;  %v1823_v60 = vsub.f32 %v1691_v30, %v2109_v7  ;;  %v1841_v30 = vsub.f32 %v199_v42, %v286_v47  ;;  %v250_v7 = vand.u32 4294901760, %v187_v10  ;;  %v307_v42 = vand.u32 4294901760, %v206_v17 }
  0x3b   : > { %v1860_v47 = vsub.f32 %v202_v54, %v295_v58  ;;  %v1874_v57 = vsub.f32 %v188_v11, %v253_v49  ;;  %v444_v34 = vsub.f32 %v1767_v26, %v443_v46  ;;  %v451_v54 = vsub.f32 %v1782_v4, %v450_v37 }
  0x3c   : > { %v1870_v55 = vpack.c.bf16 %v253_v49, %v250_v7  ;;  %v1872_v56 = vsub.f32 %v187_v10, %v250_v7  ;;  %v1879_v58 = vpack.c.bf16 %v307_v42, %v304_v41  ;;  %v1885_v61 = vsub.f32 %v206_v17, %v307_v42 }
  0x3d   : > { %v445_v42 = vand.u32 4294901760, %v444_v34  ;;  %v325_v17 = vsub.f32 %v1772_v25, %v324_v35  ;;  %v332_v7 = vsub.f32 %v1777_v24, %v331_v0  ;;  %v1469_v41 = vpack.c.bf16 %v443_v46, %v436_v32 }
  0x3e   : > { %2112 = vst [vmem:[#allocation11_spill] sm:$0xff] %v1870_v55  ;;  %2113 = vst [vmem:[#allocation12_spill] sm:$0xff] %v1879_v58  ;;  %v458_v34 = vsub.f32 %v1787_v5, %v457_v43  ;;  %v338_v11 = vand.u32 4294901760, %v1792_v6  ;;  %v471_v46 = vand.u32 4294901760, %v1811_v15 }
  0x41   : > { %1364 = vmatpush3.bf16.xpose.msra.mxu1 %v1799_v9  ;;  %1460 = vmatpush3.bf16.xpose.msra.mxu0 %v1799_v9  ;;  %v437_v9 = vsub.f32 %v1762_v33, %v436_v32  ;;  %v464_v32 = vand.u32 4294901760, %v1806_v14 }
  0x42   : > { %1366 = vmatprep.subr.bf16.mxu1 %v1818_v18  ;;  %1462 = vmatprep.subr.bf16.mxu0 %v1818_v18  ;;  %v259_v18 = vand.u32 4294901760, %v190_v45 }
  0x43   : > { %v438_v29 = vand.u32 4294901760, %v437_v9  ;;  %v333_v9 = vand.u32 4294901760, %v332_v7  ;;  %v472_v7 = vsub.f32 %v1811_v15, %v471_v46 }
  0x44   : > { %v1889_v49 = vsub.f32 %v190_v45, %v259_v18  ;;  %v1928_v10 = vpack.c.bf16 %v259_v18, %v256_v22  ;;  %v326_v45 = vand.u32 4294901760, %v325_v17  ;;  %v345_v18 = vand.u32 4294901760, %v1797_v8 }
  0x45   : > { %v1373_v63 = vpack.c.bf16 %v445_v42, %v438_v29  ;;  %v452_v22 = vand.u32 4294901760, %v451_v54  ;;  %v339_v29 = vsub.f32 %v1792_v6, %v338_v11  ;;  %v465_v17 = vsub.f32 %v1806_v14, %v464_v32 }
  0x46   : > { %2114 = vst [vmem:[#allocation13_spill] sm:$0xff] %v1928_v10  ;;  %v1375_v42 = vpack.c.bf16 %v333_v9, %v326_v45  ;;  %v346_v38 = vsub.f32 %v1797_v8, %v345_v18  ;;  %v1477_v9 = vpack.c.bf16 %v471_v46, %v464_v32  ;;  %v499_v32 = vand.u32 4294901760, %v1844_v31 }
  0x47   : > { %v340_v54 = vand.u32 4294901760, %v339_v29 }
  0x49   : > { %1368 = vmatpush3.bf16.xpose.msra.mxu1 %v1870_v55  ;;  %1464 = vmatpush3.bf16.xpose.msra.mxu0 %v1870_v55  ;;  %v1471_v55 = vpack.c.bf16 %v331_v0, %v324_v35  ;;  %v359_v35 = vand.u32 4294901760, %v1823_v60  ;;  %v473_v0 = vand.u32 4294901760, %v472_v7  ;;  %v373_v7 = vand.u32 4294901760, %v1839_v50 }
  0x4a   : > { %1370 = vmatprep.subr.bf16.mxu1 %v1879_v58  ;;  %1466 = vmatprep.subr.bf16.mxu0 %v1879_v58  ;;  %v459_v58 = vand.u32 4294901760, %v458_v34 }
  0x4c   : > { %v1377_v28 = vpack.c.bf16 %v459_v58, %v452_v22  ;;  %v466_v58 = vand.u32 4294901760, %v465_v17  ;;  %v366_v17 = vand.u32 4294901760, %v1835_v59 }
  0x4e   : > { %v1381_v45 = vpack.c.bf16 %v473_v0, %v466_v58  ;;  %v367_v58 = vsub.f32 %v1835_v59, %v366_v17  ;;  %v374_v0 = vsub.f32 %v1839_v50, %v373_v7 }
  0x51   : > { %1372 = vmatpush3.bf16.xpose.msra.mxu1 %v1928_v10  ;;  %1468 = vmatpush3.bf16.xpose.msra.mxu0 %v1928_v10  ;;  %v1473_v10 = vpack.c.bf16 %v457_v43, %v450_v37  ;;  %v478_v37 = vand.u32 4294901760, %v1828_v13  ;;  %v485_v43 = vand.u32 4294901760, %v1833_v12 }
  0x52   : > { %1374 = vmatprep.subr.bf16.mxu1 %v1373_v63  ;;  %1470 = vmatprep.subr.bf16.mxu0 %v1469_v41  ;;  %v347_v63 = vand.u32 4294901760, %v346_v38  ;;  %v352_v41 = vand.u32 4294901760, %v1816_v23  ;;  %v1563_v38 = vmov 0  }
  0x53   : > { %1554 = vset.pattern.permute.xlu0 %v1563_v38  ;;  %v479_v34 = vsub.f32 %v1828_v13, %v478_v37  ;;  %v486_v22 = vsub.f32 %v1833_v12, %v485_v43  ;;  %v1481_v38 = vpack.c.bf16 %v485_v43, %v478_v37  ;;  %v513_v37 = vand.u32 4294901760, %v1860_v47 }
  0x58   : > { %1170 = vmatmul.mubr.f32.vlgmr.msra.gmra.mrb[0].mxu1 %v1727_v44  ;;  %1272 = vmatmul.mubr.f32.vlgmr.msra.gmra.mrb[0].mxu0 %v1603_v3  ;;  %v207_v3 = vld [vmem:[%s2075_s2] sm:$0xff]  ;;  %v1379_v44 = vpack.c.bf16 %v347_v63, %v340_v54  ;;  %v492_v54 = vand.u32 4294901760, %v1841_v30  ;;  %v1479_v63 = vpack.c.bf16 %v359_v35, %v352_v41 }
  0x59   : > { %1376 = vmatpush3.bf16.xpose.msra.mxu1 %v1375_v42  ;;  %1472 = vmatpush3.bf16.xpose.msra.mxu0 %v1471_v55  ;;  %v1475_v55 = vpack.c.bf16 %v345_v18, %v338_v11  ;;  %v480_v11 = vand.u32 4294901760, %v479_v34  ;;  %v487_v18 = vand.u32 4294901760, %v486_v22  ;;  %v506_v34 = vand.u32 4294901760, %v1853_v40 }
  0x5a   : > { %1378 = vmatprep.subr.bf16.mxu1 %v1377_v28  ;;  %1474 = vmatprep.subr.bf16.mxu0 %v1473_v10  ;;  %v353_v28 = vsub.f32 %v1816_v23, %v352_v41  ;;  %v360_v10 = vsub.f32 %v1823_v60, %v359_v35  ;;  %v1483_v22 = vpack.c.bf16 %v373_v7, %v366_v17 }
  0x5b   : > { %1203 = vmatprep.mubr.f32.mxu1 %v1597_v1  ;;  %1305 = vmatprep.mubr.f32.mxu0 %v1597_v1 }
  0x5c   : > { %210 = vperm.xlu0 %1554, %v207_v3   ;;  %v354_v29 = vand.u32 4294901760, %v353_v28  ;;  %v361_v42 = vand.u32 4294901760, %v360_v10  ;;  %v1385_v3 = vpack.c.bf16 %v487_v18, %v480_v11  ;;  %v368_v28 = vand.u32 4294901760, %v367_v58 }
  0x5d   : > { %v375_v10 = vand.u32 4294901760, %v374_v0  ;;  %v1485_v18 = vpack.c.bf16 %v499_v32, %v492_v54 }
  0x5e   : > { %v1383_v46 = vpack.c.bf16 %v361_v42, %v354_v29 }
  0x5f   : > { %v1387_v43 = vpack.c.bf16 %v375_v10, %v368_v28 }
  0x61   : > { %1380 = vmatpush3.bf16.xpose.msra.mxu1 %v1379_v44  ;;  %1476 = vmatpush3.bf16.xpose.msra.mxu0 %v1475_v55  ;;  %v493_v44 = vsub.f32 %v1841_v30, %v492_v54  ;;  %v500_v55 = vsub.f32 %v1844_v31, %v499_v32  ;;  %v527_v54 = vand.u32 4294901760, %v1868_v53 }
  0x62   : > { %1382 = vmatprep.subr.bf16.mxu1 %v1381_v45  ;;  %1478 = vmatprep.subr.bf16.mxu0 %v1477_v9  ;;  %v380_v45 = vand.u32 4294901760, %v1846_v21  ;;  %v387_v9 = vand.u32 4294901760, %v1848_v39 }
  0x63   : > { %v494_v41 = vand.u32 4294901760, %v493_v44  ;;  %v501_v35 = vand.u32 4294901760, %v500_v55  ;;  %v520_v44 = vand.u32 4294901760, %v1866_v52 }
  0x64   : > { %v381_v29 = vsub.f32 %v1846_v21, %v380_v45  ;;  %v388_v42 = vsub.f32 %v1848_v39, %v387_v9  ;;  %v1487_v55 = vpack.c.bf16 %v387_v9, %v380_v45 }
  0x65   : > { %v1389_v11 = vpack.c.bf16 %v501_v35, %v494_v41  ;;  %v1489_v35 = vpack.c.bf16 %v513_v37, %v506_v34 }
  0x66   : > { %v382_v58 = vand.u32 4294901760, %v381_v29  ;;  %v389_v0 = vand.u32 4294901760, %v388_v42 }
  0x68   : > { %v1391_v32 = vpack.c.bf16 %v389_v0, %v382_v58 }
  0x69   : > { %1384 = vmatpush3.bf16.xpose.msra.mxu1 %v1383_v46  ;;  %1480 = vmatpush3.bf16.xpose.msra.mxu0 %v1479_v63  ;;  %v507_v46 = vsub.f32 %v1853_v40, %v506_v34  ;;  %v514_v63 = vsub.f32 %v1860_v47, %v513_v37  ;;  %v541_v34 = vand.u32 4294901760, %v1885_v61 }
  0x6a   : > { %1386 = vmatprep.subr.bf16.mxu1 %v1385_v3  ;;  %1482 = vmatprep.subr.bf16.mxu0 %v1481_v38  ;;  %v394_v3 = vand.u32 4294901760, %v1862_v48  ;;  %v401_v38 = vand.u32 4294901760, %v1864_v51 }
  0x6b   : > { %v508_v17 = vand.u32 4294901760, %v507_v46  ;;  %v515_v7 = vand.u32 4294901760, %v514_v63  ;;  %v534_v46 = vand.u32 4294901760, %v1881_v36 }
  0x6c   : > { %v395_v28 = vsub.f32 %v1862_v48, %v394_v3  ;;  %v402_v10 = vsub.f32 %v1864_v51, %v401_v38  ;;  %v1491_v63 = vpack.c.bf16 %v401_v38, %v394_v3 }
  0x6d   : > { %v1393_v41 = vpack.c.bf16 %v515_v7, %v508_v17  ;;  %v1493_v7 = vpack.c.bf16 %v527_v54, %v520_v44 }
  0x6e   : > { %v396_v29 = vand.u32 4294901760, %v395_v28  ;;  %v403_v42 = vand.u32 4294901760, %v402_v10 }
  0x70   : > { %v1395_v37 = vpack.c.bf16 %v403_v42, %v396_v29  ;;  %v1497_v42 = vpack.c.bf16 %v541_v34, %v534_v46 }
  0x71   : > { %1388 = vmatpush3.bf16.xpose.msra.mxu1 %v1387_v43  ;;  %1484 = vmatpush3.bf16.xpose.msra.mxu0 %v1483_v22  ;;  %v521_v43 = vsub.f32 %v1866_v52, %v520_v44  ;;  %v528_v22 = vsub.f32 %v1868_v53, %v527_v54 }
  0x72   : > { %1390 = vmatprep.subr.bf16.mxu1 %v1389_v11  ;;  %1486 = vmatprep.subr.bf16.mxu0 %v1485_v18  ;;  %v408_v11 = vand.u32 4294901760, %v1872_v56  ;;  %v415_v18 = vand.u32 4294901760, %v1874_v57 }
  0x73   : > { %v522_v45 = vand.u32 4294901760, %v521_v43  ;;  %v529_v9 = vand.u32 4294901760, %v528_v22 }
  0x74   : > { %v409_v58 = vsub.f32 %v1872_v56, %v408_v11  ;;  %v416_v0 = vsub.f32 %v1874_v57, %v415_v18  ;;  %v1495_v22 = vpack.c.bf16 %v415_v18, %v408_v11  ;;  %v2116_v11 = vpack.c.bf16 %v1777_v24, %v1772_v25 }
  0x75   : > { %v1397_v17 = vpack.c.bf16 %v529_v9, %v522_v45  ;;  %v2117_v18 = vpack.c.bf16 %v1787_v5, %v1782_v4  ;;  %v2119_v24 = vpack.c.bf16 %v1811_v15, %v1806_v14  ;;  %v2121_v25 = vpack.c.bf16 %v1823_v60, %v1816_v23  ;;  %v2126_v4 = vld [vmem:[#allocation5_spill] sm:$0xff]  ;;  %v2128_v60 = vld [vmem:[#allocation6_spill] sm:$0xff] }
  0x76   : > { %v410_v28 = vand.u32 4294901760, %v409_v58  ;;  %v417_v10 = vand.u32 4294901760, %v416_v0  ;;  %v2115_v58 = vpack.c.bf16 %v1767_v26, %v1762_v33  ;;  %v2123_v26 = vpack.c.bf16 %v1833_v12, %v1828_v13  ;;  %v2124_v33 = vld [vmem:[#allocation4_spill] sm:$0xff]  ;;  %v2134_v15 = vld [vmem:[#allocation9_spill] sm:$0xff]  ;;  %v2138_v12 = vld [vmem:[#allocation11_spill] sm:$0xff] }
  0x77   : > { %v2127_v5 = vpack.c.bf16 %v1844_v31, %v1841_v30  ;;  %v2131_v14 = vpack.c.bf16 %v1860_v47, %v1853_v40  ;;  %v2135_v23 = vpack.c.bf16 %v1868_v53, %v1866_v52  ;;  %v2137_v13 = vpack.c.bf16 %v1874_v57, %v1872_v56  ;;  %v2140_v31 = vld [vmem:[#allocation12_spill] sm:$0xff]  ;;  %v2142_v40 = vld [vmem:[#allocation13_spill] sm:$0xff] }
  0x78   : > { %v1399_v43 = vpack.c.bf16 %v417_v10, %v410_v28  ;;  %v2139_v30 = vpack.c.bf16 %v1885_v61, %v1881_v36 }
  0x79   : > { %1392 = vmatpush3.bf16.xpose.msra.mxu1 %v1391_v32  ;;  %1488 = vmatpush3.bf16.xpose.msra.mxu0 %v1487_v55  ;;  %v535_v32 = vsub.f32 %v1881_v36, %v534_v46  ;;  %v542_v55 = vsub.f32 %v1885_v61, %v541_v34 }
  0x7a   : > { %1394 = vmatprep.subr.bf16.mxu1 %v1393_v41  ;;  %1490 = vmatprep.subr.bf16.mxu0 %v1489_v35  ;;  %v422_v41 = vand.u32 4294901760, %v1887_v62  ;;  %v429_v35 = vand.u32 4294901760, %v1889_v49 }
  0x7b   : > { %v536_v3 = vand.u32 4294901760, %v535_v32  ;;  %v543_v38 = vand.u32 4294901760, %v542_v55 }
  0x7c   : > { %v423_v44 = vsub.f32 %v1887_v62, %v422_v41  ;;  %v430_v54 = vsub.f32 %v1889_v49, %v429_v35 }
  0x7d   : > { %v1401_v29 = vpack.c.bf16 %v543_v38, %v536_v3 }
  0x7e   : > { %v424_v45 = vand.u32 4294901760, %v423_v44  ;;  %v431_v9 = vand.u32 4294901760, %v430_v54 }
  0x81   : > { %1396 = vmatpush3.bf16.xpose.msra.mxu1 %v1395_v37  ;;  %1492 = vmatpush3.bf16.xpose.msra.mxu0 %v1491_v63  ;;  %v1403_v37 = vpack.c.bf16 %v431_v9, %v424_v45  ;;  %v1499_v63 = vpack.c.bf16 %v429_v35, %v422_v41 }
  0x82   : > { %1398 = vmatprep.subr.bf16.mxu1 %v1397_v17  ;;  %1494 = vmatprep.subr.bf16.mxu0 %v1493_v7 }
  0x89   : > { %1400 = vmatpush3.bf16.xpose.msra.mxu1 %v1399_v43  ;;  %1496 = vmatpush3.bf16.xpose.msra.mxu0 %v1495_v22 }
  0x8a   : > { %1402 = vmatprep.subr.bf16.mxu1 %v1401_v29  ;;  %1498 = vmatprep.subr.bf16.mxu0 %v1497_v42 }
  0x91   : > { %1404 = vmatpush3.bf16.xpose.msra.mxu1 %v1403_v37  ;;  %1500 = vmatpush3.bf16.xpose.msra.mxu0 %v1499_v63 }
  0x92   : > { %1406 = vmatprep.subr.bf16.mxu1 %v2115_v58  ;;  %1502 = vmatprep.subr.bf16.mxu0 %v1639_v16  ;;  %v2118_v16 = vpack.c.bf16 %v1797_v8, %v1792_v6  ;;  %v2129_v6 = vpack.c.bf16 %v1848_v39, %v1846_v21  ;;  %v2130_v8 = vld [vmem:[#allocation7_spill] sm:$0xff]  ;;  %v2136_v39 = vld [vmem:[#allocation10_spill] sm:$0xff]  ;;  %v2141_v21 = vpack.c.bf16 %v1889_v49, %v1887_v62 }
  0x98   : > { %1204 = vmatmul.mubr.f32.vlgmr.msra.gmra.mrb[0].mxu1 %v1597_v1  ;;  %1306 = vmatmul.mubr.f32.vlgmr.msra.gmra.mrb[0].mxu0 %v1597_v1 }
  0x99   : > { %1408 = vmatpush3.bf16.xpose.msra.mxu1 %v2116_v11  ;;  %1504 = vmatpush3.bf16.xpose.msra.mxu0 %v1651_v19  ;;  %v2120_v19 = vld [vmem:[#allocation2_spill] sm:$0xff] }
  0x9a   : > { %1410 = vmatprep.subr.bf16.mxu1 %v2117_v18  ;;  %1506 = vmatprep.subr.bf16.mxu0 %v1657_v20  ;;  %v2122_v20 = vld [vmem:[#allocation3_spill] sm:$0xff] }
  0x9b   : > { %1237 = vmatprep.mubr.f32.mxu1 %v1600_v2  ;;  %1339 = vmatprep.mubr.f32.mxu0 %v1597_v1 }
  0xa1   : > { %1412 = vmatpush3.bf16.xpose.msra.mxu1 %v2118_v16  ;;  %1508 = vmatpush3.bf16.xpose.msra.mxu0 %v1679_v27  ;;  %v2125_v27 = vpack.c.bf16 %v1839_v50, %v1835_v59  ;;  %v2132_v50 = vld [vmem:[#allocation8_spill] sm:$0xff]  ;;  %v2133_v59 = vpack.c.bf16 %v1864_v51, %v1862_v48 }
  0xa2   : > { %1414 = vmatprep.subr.bf16.mxu1 %v2119_v24  ;;  %1510 = vmatprep.subr.bf16.mxu0 %v2120_v19 }
  0xa9   : > { %1416 = vmatpush3.bf16.xpose.msra.mxu1 %v2121_v25  ;;  %1512 = vmatpush3.bf16.xpose.msra.mxu0 %v2122_v20 }
  0xaa   : > { %1418 = vmatprep.subr.bf16.mxu1 %v2123_v26  ;;  %1514 = vmatprep.subr.bf16.mxu0 %v2124_v33 }
  0xb1   : > { %1420 = vmatpush3.bf16.xpose.msra.mxu1 %v2125_v27  ;;  %1516 = vmatpush3.bf16.xpose.msra.mxu0 %v2126_v4 }
  0xb2   : > { %1422 = vmatprep.subr.bf16.mxu1 %v2127_v5  ;;  %1518 = vmatprep.subr.bf16.mxu0 %v2128_v60 }
  0xb9   : > { %1424 = vmatpush3.bf16.xpose.msra.mxu1 %v2129_v6  ;;  %1520 = vmatpush3.bf16.xpose.msra.mxu0 %v2130_v8 }
  0xba   : > { %1426 = vmatprep.subr.bf16.mxu1 %v2131_v14  ;;  %1522 = vmatprep.subr.bf16.mxu0 %v2132_v50 }
  0xc1   : > { %1428 = vmatpush3.bf16.xpose.msra.mxu1 %v2133_v59  ;;  %1524 = vmatpush3.bf16.xpose.msra.mxu0 %v2134_v15 }
  0xc2   : > { %1430 = vmatprep.subr.bf16.mxu1 %v2135_v23  ;;  %1526 = vmatprep.subr.bf16.mxu0 %v2136_v39 }
  0xc9   : > { %1432 = vmatpush3.bf16.xpose.msra.mxu1 %v2137_v13  ;;  %1528 = vmatpush3.bf16.xpose.msra.mxu0 %v2138_v12 }
  0xca   : > { %1434 = vmatprep.subr.bf16.mxu1 %v2139_v30  ;;  %1530 = vmatprep.subr.bf16.mxu0 %v2140_v31 }
  0xd1   : > { %1436 = vmatpush3.bf16.xpose.msra.mxu1 %v2141_v21  ;;  %1532 = vmatpush3.bf16.xpose.msra.mxu0 %v2142_v40 }
  0xd8   : > { %1238 = vmatmul.mubr.f32.vlgmr.msra.gmra.mrb[0].mxu1 %v1600_v2  ;;  %1340 = vmatmul.mubr.f32.vlgmr.msra.gmra.mrb[0].mxu0 %v1597_v1 }
  0xdb   : > { %v211_v47 = vpop.permute.xlu0 %210 }
 0x1ab   : > { %v685_v48 = vpop.f32.mrb[0].mxu1  ;;  %v1063_v51 = vpop.f32.mrb[0].mxu0 }
 0x1ac   : > { %v1533_v52 = vadd.f32 %v685_v48, %v211_v47  ;;  %v687_v53 = vpop.f32.mrb[1].mxu1  ;;  %v1065_v56 = vpop.f32.mrb[1].mxu0 }
 0x1ad   : > { %v1535_v57 = vadd.f32 %v687_v53, %v211_v47 }
 0x1ae   : > { %v1534_v36 = vadd.f32 %v1533_v52, %v1063_v51 }
 0x1af   : > { %v1536_v2 = vadd.f32 %v1535_v57, %v1065_v56 }
 0x1b0   : > { %1068 = vst [vmem:[%s172_s27] sm:$0xff] %v1534_v36 }
 0x1b1   : > { %1069 = vst [vmem:[%s172_s27 + $0x8] sm:$0xff] %v1536_v2 }
 0x1b2 PF: > { %s13_s12 = sadd.s32 1, %s1561_s12  }
 0x1b3   : > { %p10_p5 = scmp.ge.s32.totalorder %s13_s12, 4  }
 0x1b5   :  { %12 = sbr.rel (!%p10_p5) target bundleno = 1 (0x1), region = 62 }

</bundles_post_ra>
